<compile_context>
chip_gen: v6e
topology: v6e:2x2x1
jax: 0.10.0
libtpu: 0.0.40
codegen_flags: <defaults>
</compile_context>

<pallas_src>
import functools

import jax
import jax.numpy as jnp
from jax.experimental import pallas as pl
from jax.experimental.pallas import tpu as pltpu


def _round_up(x, m):
    return (x + m - 1) // m * m


def mlp_decoder_kernel(z_ref, w1_ref, b1_ref, w2_ref, b2_ref,
                       mu_ref, logvar_ref, *, d):
    # z_ref:  [TM, d]   caller dtype (cast to bf16 in-kernel)
    # w1_ref: [d,  Hp]  bf16,  b1_ref: [1, Hp]   f32
    # w2_ref: [Hp, 2d]  bf16,  b2_ref: [1, 2d]   f32
    # mu_ref / logvar_ref: [TM, d]  out_dtype
    z = z_ref[...].astype(jnp.bfloat16)

    # Linear 1 + ReLU: bf16 operands, f32 accumulation on the MXU.
    h = jnp.dot(z, w1_ref[...], preferred_element_type=jnp.float32) + b1_ref[...]
    h = jnp.maximum(h, 0.0).astype(jnp.bfloat16)

    # Linear 2: single fused dot over the concatenated (mu | logvar) weight,
    # then static slices -> better MXU fill on 256-wide MXUs (v6e/v7x).
    theta = jnp.dot(h, w2_ref[...], preferred_element_type=jnp.float32) + b2_ref[...]

    # chunk(theta, 2, -1): first d columns -> mu, last d -> logvar.
    mu_ref[...] = theta[:, :d].astype(mu_ref.dtype)
    logvar_ref[...] = theta[:, d:].astype(logvar_ref.dtype)


def prepare_decoder_params(w1, b1, w2, b2):
    """One-time weight prep (hoist out of the per-call jitted path).

    Casts weights to bf16, pads the hidden dim to a lane (128) multiple,
    keeps biases in f32.  w2 stays concatenated [H, 2*d] (mu | logvar).
    """
    d, H = w1.shape
    assert w2.shape[0] == H and w2.shape[1] == 2 * d, \
        "network must be d -> H -> 2*d for chunk(theta, 2, -1)"
    Hp = _round_up(H, 128)
    w1p = jnp.pad(w1.astype(jnp.bfloat16), ((0, 0), (0, Hp - H)))
    b1p = jnp.pad(b1.reshape(1, -1).astype(jnp.float32), ((0, 0), (0, Hp - H)))
    w2p = jnp.pad(w2.astype(jnp.bfloat16), ((0, Hp - H), (0, 0)))   # [Hp, 2d]
    b2p = b2.reshape(1, -1).astype(jnp.float32)                     # [1, 2d]
    return w1p, b1p, w2p, b2p


def _vmem_budget_bytes(TM, d, Hp, z_itemsize, out_itemsize):
    """VMEM budget from actual shapes: double-buffered gridded blocks +
    (double-buffered) resident weights + f32 temps, with 1.5x headroom.
    Capped at 48 MiB so it is always safe on v7x's 64 MiB VMEM."""
    dbl = 2
    z_blk = TM * d * z_itemsize
    out_blk = 2 * TM * d * out_itemsize
    wts = d * Hp * 2 + Hp * 4 + Hp * (2 * d) * 2 + (2 * d) * 4
    temps = TM * Hp * 4 + TM * Hp * 2 + TM * (2 * d) * 4  # f32 h, bf16 h, f32 theta
    est = dbl * (z_blk + out_blk + wts) + temps
    return int(min(est * 1.5 + (2 << 20), 48 << 20))


def mlp_decoder_forward(z, params, *, tm=2048, out_dtype=jnp.bfloat16):
    """MLPDecoder.forward: z [Bs, T, d] -> (mu, logvar), each [Bs, T, d].

    Note: outputs default to bf16 (f32 MXU accumulation is rounded on store);
    pass out_dtype=jnp.float32 for full-precision outputs.
    """
    w1p, b1p, w2p, b2p = params
    Bs, T, d = z.shape
    Hp = w1p.shape[1]
    assert w1p.shape[0] == d and w2p.shape == (Hp, 2 * d)

    M = Bs * T
    # Row tile: multiple of 8 sublanes; capped at ~ceil(M/2) so the parallel
    # row axis always has >= 2 tiles (both v7x TensorCores busy).
    tm = max(8, _round_up(int(tm), 8))
    TM = min(tm, max(8, _round_up((M + 1) // 2, 8)))
    grid = (pl.cdiv(M, TM),)          # no row padding; OOB writes are dropped

    z2d = z.reshape(M, d)             # no cast, no pad: cast happens in-kernel

    row_spec = pl.BlockSpec((TM, d), lambda i: (i, 0))
    const = lambda shape: pl.BlockSpec(shape, lambda i: (0, 0))  # VMEM-resident

    kernel = functools.partial(mlp_decoder_kernel, d=d)

    mu2d, lv2d = pl.pallas_call(
        kernel,
        out_shape=(jax.ShapeDtypeStruct((M, d), out_dtype),
                   jax.ShapeDtypeStruct((M, d), out_dtype)),
        grid_spec=pltpu.PrefetchScalarGridSpec(
            num_scalar_prefetch=0,
            grid=grid,
            in_specs=[row_spec,
                      const((d, Hp)), const((1, Hp)),
                      const((Hp, 2 * d)), const((1, 2 * d))],
            out_specs=(row_spec, row_spec),
        ),
        compiler_params=pltpu.CompilerParams(
            dimension_semantics=("parallel",),  # megacore sharding on v7x
            vmem_limit_bytes=_vmem_budget_bytes(
                TM, d, Hp, z.dtype.itemsize, jnp.dtype(out_dtype).itemsize),
        ),
    )(z2d, w1p, b1p, w2p, b2p)

    return mu2d.reshape(Bs, T, d), lv2d.reshape(Bs, T, d)


def init_params(key, d, hidden):
    """Deterministic MLP params: d -> hidden -> 2*d."""
    k1, k2 = jax.random.split(key)
    w1 = (jax.random.normal(k1, (d, hidden), jnp.float32) / jnp.sqrt(d)).astype(jnp.float32)
    b1 = jnp.zeros((1, hidden), jnp.float32)
    w2 = (jax.random.normal(k2, (hidden, 2 * d), jnp.float32) / jnp.sqrt(hidden)).astype(jnp.float32)
    b2 = jnp.zeros((1, 2 * d), jnp.float32)
    return w1, b1, w2, b2


if __name__ == "__main__":
    key = jax.random.PRNGKey(0)
    kz, kp = jax.random.split(key)

    Bs, T, d, hidden = 2, 8, 32, 64
    z = jax.random.normal(kz, (Bs, T, d), jnp.float32)
    w1, b1, w2, b2 = init_params(kp, d, hidden)

    params = prepare_decoder_params(w1, b1, w2, b2)   # one-time weight prep
    fwd = jax.jit(mlp_decoder_forward)
    mu, logvar = fwd(z, params)
    jax.block_until_ready((mu, logvar))

    # Pure-JAX reference with the same bf16-operand / f32-accumulate contract.
    zb = z.reshape(-1, d).astype(jnp.bfloat16)
    w1b, w2b = w1.astype(jnp.bfloat16), w2.astype(jnp.bfloat16)
    h_ref = jnp.maximum(
        jnp.dot(zb, w1b, preferred_element_type=jnp.float32) + b1.reshape(-1), 0.0
    ).astype(jnp.bfloat16)
    theta_ref = (jnp.dot(h_ref, w2b, preferred_element_type=jnp.float32)
                 + b2.reshape(-1)).reshape(Bs, T, 2 * d)
    mu_ref, logvar_ref = jnp.split(theta_ref, 2, axis=-1)

    assert mu.shape == (Bs, T, d) and logvar.shape == (Bs, T, d)
    # Outputs are bf16 by default -> tolerance covers bf16 output rounding.
    assert jnp.allclose(mu.astype(jnp.float32), mu_ref, atol=2e-2, rtol=2e-2)
    assert jnp.allclose(logvar.astype(jnp.float32), logvar_ref, atol=2e-2, rtol=2e-2)

    print("KERNEL_OK")
</pallas_src>

<mosaic_0001>
module attributes {stable_mosaic.version = 11 : i64} {
  func.func @mlp_decoder_kernel(%arg0: i32, %arg1: memref<8x32xf32, #tpu.memory_space<vmem>>, %arg2: memref<32x128xbf16, #tpu.memory_space<vmem>>, %arg3: memref<1x128xf32, #tpu.memory_space<vmem>>, %arg4: memref<128x64xbf16, #tpu.memory_space<vmem>>, %arg5: memref<1x64xf32, #tpu.memory_space<vmem>>, %arg6: memref<8x32xbf16, #tpu.memory_space<vmem>>, %arg7: memref<8x32xbf16, #tpu.memory_space<vmem>>) attributes {dimension_semantics = [#tpu.dimension_semantics<parallel>], iteration_bounds = array<i64: 2>, scalar_prefetch = 0 : i64, scratch_operands = 0 : i64, tpu.core_type = #tpu.core_type<tc>, window_params = [{transform_indices = @transform_0, window_bounds = array<i64: 8, 32>}, {pipeline_mode = #tpu.pipeline_mode<synchronous>, transform_indices = @transform_1, window_bounds = array<i64: 32, 128>}, {pipeline_mode = #tpu.pipeline_mode<synchronous>, transform_indices = @transform_2, window_bounds = array<i64: 1, 128>}, {pipeline_mode = #tpu.pipeline_mode<synchronous>, transform_indices = @transform_3, window_bounds = array<i64: 128, 64>}, {pipeline_mode = #tpu.pipeline_mode<synchronous>, transform_indices = @transform_4, window_bounds = array<i64: 1, 64>}, {transform_indices = @transform_5, window_bounds = array<i64: 8, 32>}, {transform_indices = @transform_6, window_bounds = array<i64: 8, 32>}]} {
    %c0 = arith.constant 0 : index
    %c0_0 = arith.constant 0 : index
    %0 = vector.load %arg1[%c0, %c0_0] : memref<8x32xf32, #tpu.memory_space<vmem>>, vector<8x32xf32>
    %1 = arith.truncf %0 : vector<8x32xf32> to vector<8x32xbf16>
    %c0_1 = arith.constant 0 : index
    %c0_2 = arith.constant 0 : index
    %2 = vector.load %arg2[%c0_1, %c0_2] : memref<32x128xbf16, #tpu.memory_space<vmem>>, vector<32x128xbf16>
    %cst = arith.constant dense<0.000000e+00> : vector<8x128xf32>
    %3 = tpu.matmul %1, %2, %cst {dimension_numbers = #tpu.dot_dimension_numbers<[1], [0], [0], [1], [0, 0, 1, 1], [], []>} : vector<8x32xbf16>, vector<32x128xbf16>, vector<8x128xf32> -> vector<8x128xf32>
    %c0_3 = arith.constant 0 : index
    %c0_4 = arith.constant 0 : index
    %4 = vector.load %arg3[%c0_3, %c0_4] : memref<1x128xf32, #tpu.memory_space<vmem>>, vector<1x128xf32>
    %5 = vector.broadcast %4 : vector<1x128xf32> to vector<8x128xf32>
    %6 = arith.addf %3, %5 : vector<8x128xf32>
    %cst_5 = arith.constant 0.000000e+00 : f32
    %7 = vector.broadcast %cst_5 : f32 to vector<8x128xf32>
    %8 = arith.maximumf %6, %7 : vector<8x128xf32>
    %9 = arith.truncf %8 : vector<8x128xf32> to vector<8x128xbf16>
    %c0_6 = arith.constant 0 : index
    %c0_7 = arith.constant 0 : index
    %10 = vector.load %arg4[%c0_6, %c0_7] : memref<128x64xbf16, #tpu.memory_space<vmem>>, vector<128x64xbf16>
    %cst_8 = arith.constant dense<0.000000e+00> : vector<8x64xf32>
    %11 = tpu.matmul %9, %10, %cst_8 {dimension_numbers = #tpu.dot_dimension_numbers<[1], [0], [0], [1], [0, 0, 1, 1], [], []>} : vector<8x128xbf16>, vector<128x64xbf16>, vector<8x64xf32> -> vector<8x64xf32>
    %c0_9 = arith.constant 0 : index
    %c0_10 = arith.constant 0 : index
    %12 = vector.load %arg5[%c0_9, %c0_10] : memref<1x64xf32, #tpu.memory_space<vmem>>, vector<1x64xf32>
    %13 = vector.broadcast %12 : vector<1x64xf32> to vector<8x64xf32>
    %14 = arith.addf %11, %13 : vector<8x64xf32>
    %15 = vector.extract_strided_slice %14 {offsets = [0, 0], sizes = [8, 32], strides = [1, 1]} : vector<8x64xf32> to vector<8x32xf32>
    %16 = arith.truncf %15 : vector<8x32xf32> to vector<8x32xbf16>
    %c0_11 = arith.constant 0 : index
    %c0_12 = arith.constant 0 : index
    %17 = vector.load %arg6[%c0_11, %c0_12] : memref<8x32xbf16, #tpu.memory_space<vmem>>, vector<8x32xbf16>
    tpu.vector_store %arg6[%c0_11, %c0_12], %16 {strides = array<i32>} : memref<8x32xbf16, #tpu.memory_space<vmem>>, vector<8x32xbf16>,
    %18 = vector.extract_strided_slice %14 {offsets = [0, 32], sizes = [8, 32], strides = [1, 1]} : vector<8x64xf32> to vector<8x32xf32>
    %19 = arith.truncf %18 : vector<8x32xf32> to vector<8x32xbf16>
    %c0_13 = arith.constant 0 : index
    %c0_14 = arith.constant 0 : index
    %20 = vector.load %arg7[%c0_13, %c0_14] : memref<8x32xbf16, #tpu.memory_space<vmem>>, vector<8x32xbf16>
    tpu.vector_store %arg7[%c0_13, %c0_14], %19 {strides = array<i32>} : memref<8x32xbf16, #tpu.memory_space<vmem>>, vector<8x32xbf16>,
    return
  }
  func.func @transform_0(%arg0: i32) -> (i32, i32) {
    %c0_i32 = arith.constant 0 : i32
    %c0_i32_0 = arith.constant 0 : i32
    return %arg0, %c0_i32 : i32, i32
  }
  func.func @transform_1(%arg0: i32) -> (i32, i32) {
    %c0_i32 = arith.constant 0 : i32
    %c0_i32_0 = arith.constant 0 : i32
    %c0_i32_1 = arith.constant 0 : i32
    return %c0_i32, %c0_i32_0 : i32, i32
  }
  func.func @transform_2(%arg0: i32) -> (i32, i32) {
    %c0_i32 = arith.constant 0 : i32
    %c0_i32_0 = arith.constant 0 : i32
    %c0_i32_1 = arith.constant 0 : i32
    return %c0_i32, %c0_i32_0 : i32, i32
  }
  func.func @transform_3(%arg0: i32) -> (i32, i32) {
    %c0_i32 = arith.constant 0 : i32
    %c0_i32_0 = arith.constant 0 : i32
    %c0_i32_1 = arith.constant 0 : i32
    return %c0_i32, %c0_i32_0 : i32, i32
  }
  func.func @transform_4(%arg0: i32) -> (i32, i32) {
    %c0_i32 = arith.constant 0 : i32
    %c0_i32_0 = arith.constant 0 : i32
    %c0_i32_1 = arith.constant 0 : i32
    return %c0_i32, %c0_i32_0 : i32, i32
  }
  func.func @transform_5(%arg0: i32) -> (i32, i32) {
    %c0_i32 = arith.constant 0 : i32
    %c0_i32_0 = arith.constant 0 : i32
    return %arg0, %c0_i32 : i32, i32
  }
  func.func @transform_6(%arg0: i32) -> (i32, i32) {
    %c0_i32 = arith.constant 0 : i32
    %c0_i32_0 = arith.constant 0 : i32
    return %arg0, %c0_i32 : i32, i32
  }
}

</mosaic_0001>

<bundles_post_ra>
// kernel: mlp_decoder_forward.1
= control target key start
LH: loop header
LB: loop body
LE: loop exit
PB: predicated region body
PF: predicated region fallthrough
CT: control target
= control target key end

     0   :  { %12 = vsyncpa [#allocation3], 0  ;;  %s1002_s0 = inlined_call_operand.vmem [shape: f32[16,32], index: 0, kind: input, shape index: {}]   ;;  %s1003_s1 = inlined_call_operand.vmem [shape: bf16[32,128], index: 1, kind: input, shape index: {}]   ;;  %s1004_s2 = inlined_call_operand.vmem [shape: f32[1,128], index: 2, kind: input, shape index: {}]   ;;  %s1005_s3 = inlined_call_operand.vmem [shape: bf16[128,64], index: 3, kind: input, shape index: {}]   ;;  %s1006_s4 = inlined_call_operand.vmem [shape: f32[1,64], index: 4, kind: input, shape index: {}]   ;;  %s1007_s5 = inlined_call_operand.hbm [shape: bf16[16,32], index: 5, kind: output, shape index: {0}]   ;;  %s1008_s6 = inlined_call_operand.hbm [shape: bf16[16,32], index: 6, kind: output, shape index: {1}]  }
   0x1   :  { %14 = vsyncpa [#allocation3 + $0x1], 0 }
   0x2   :  { %15 = vsyncpa [#allocation5], 0 }
   0x3   :  { %17 = vsyncpa [#allocation5 + $0x1], 0  ;;  %s831_s21 = smov 0   ;;  %s833_s22 = smov 0  }
   0x4   :  { %s835_s23 = smov 0   ;;  %s837_s24 = smov 0  }
   0x5 LB: > { %s852_s25 = sadd.s32 4294967295, %s789_s24   ;;  %s574_s26 = sadd.s32 4294967294, %s789_s24   ;;  %s789_s24 = sphi %s837_s24, %s1014_s24   ;;  %s785_s23 = sphi %s835_s23, %s1013_s23   ;;  %s781_s22 = sphi %s833_s22, %s1012_s22   ;;  %s777_s21 = sphi %s831_s21, %s1011_s21  }
   0x6   : > { %s856_s27 = sadd.s32 1, %s789_s24   ;;  %s140_s28 = sadd.s32 1, %s785_s23 }
   0x7   : > { %s137_s29 = ssub.s32 %s789_s24, %s856_s27  ;;  %p150_p0 = scmp.ne.s32.totalorder %s785_s23, %s781_s22 }
   0x8   : > { %p138_p1 = scmp.eq.s32.totalorder %s137_s29, 0  ;;  %p151_p2 = scmp.eq.s32.totalorder %s852_s25, 1 }
   0x9   : > { %p156_p3 = scmp.ne.s32.totalorder %s781_s22, %s777_s21  ;;  %p157_p4 = scmp.eq.s32.totalorder %s574_s26, 1 }
   0xa   : > { %s867_s30 = scalar_select %p138_p1, %s785_s23, %s140_s28  }
   0xb   : > { %p869_p5 = por %p151_p2, %p150_p0  ;;  %p873_p6 = por %p157_p4, %p156_p3 }
   0xc   : > { %p577_p7 = scmp.ge.s32.totalorder %s789_s24, 1  ;;  %p220_p8 = scmp.lt.s32.totalorder %s789_s24, 3 }
   0xe   : > { %p221_p9 = pnand %p577_p7, %p220_p8 }
   0xf   : > { %p254_p10 = scmp.lt.s32.totalorder (!%p221_p9), %s852_s25, 1  ;;  %s597_s10 = sshll.u32 (!%p221_p9), %s852_s25, 6 }
  0x10   : > { %224 = sbr.rel (%p221_p9) target bundleno = 554 (0x22a), region = 40  ;;  %s793_s16 = smov (!%p221_p9), 96  }
  0x11   : > { %s794_s19 = smov (!%p221_p9), [#allocation2]  }
  0x12   : > { %s703_s20 = sshll.u32 (!%p221_p9), %s794_s19, 4  ;;  %s704_s20 = int_to_ptr.vmem [resolvable:$false] %s703_s20 }
  0x13   : > { %s705_s29 = scalar_lea.vmem (!%p221_p9), %s704_s20, 128 }
  0x15   : > { %v689_v0 = vld [vmem:[%s1003_s1 + $0x8] sm:$0xff]   ;;  %v791_v1 = vmov 0.0   ;;  %v690_v2 = vld [vmem:[%s1003_s1] sm:$0xff]   ;;  %vm792_vm0 = vmmov 0   ;;  %v691_v3 = vld [vmem:[%s1005_s3 + $0x38] sm:$0xff]   ;;  %s255_s15 = scalar_select %p254_p10, %s852_s25, 1 }
  0x16   : > { %614 = vmatprep.subr.bf16.mxu0 %v791_v1  ;;  %622 = vmatprep.subr.bf16.mxu1 %v791_v1  ;;  %v692_v4 = vld [vmem:[%s1005_s3 + $0x30] sm:$0xff]   ;;  %vm284_vm1 = vcmask 261120   ;;  %v693_v6 = vld [vmem:[%s1005_s3 + $0x28] sm:$0xff]   ;;  %v694_v8 = vld [vmem:[%s1005_s3 + $0x20] sm:$0xff]   ;;  %vm442_vm2 = vcmask 257024  }
  0x17   : > { %615 = vmatpush3.bf16.msra.mxu0 %v689_v0  ;;  %618 = vmatprep.mubr.msk.bf16.mxu0 %vm792_vm0, %v791_v1  ;;  %s580_s18 = sshll.u32 %s255_s15, 3  ;;  %v695_v9 = vld [vmem:[%s1005_s3 + $0x18] sm:$0xff]   ;;  %v696_v10 = vld [vmem:[%s1005_s3 + $0x10] sm:$0xff]   ;;  %v697_v11 = vld [vmem:[%s1005_s3 + $0x8] sm:$0xff]   ;;  %s932_s15 = scalar_lea.hbm %s1007_s5, %s597_s10 }
  0x18   : > { %616 = vmatprep.subr.bf16.mxu0 %v791_v1  ;;  %638 = vmatprep.mubr.msk.bf16.mxu1 %vm792_vm0, %v791_v1  ;;  %s257_s26 = scalar_lea.vmem %s1002_s0, %s580_s18  ;;  %v698_v12 = vld [vmem:[%s1005_s3] sm:$0xff]  }
  0x19   : > { %623 = vmatpush3.bf16.msra.mxu1 %v691_v3  ;;  %v259_v5 = vld [vmem:[%s257_s26] sm:$0xff]  ;;  %s918_s26 = sand.u32 1, %s781_s22  }
  0x1a   : > { %624 = vmatprep.subr.bf16.mxu1 %v791_v1  ;;  %v260_v7 = vpack.c.bf16 %v259_v5, %v259_v5  ;;  %v581_v13 = vld [vmem:[%s1004_s2] ss:$0 sm:$0xff]  ;;  %s578_s28 = sshll.u32 %s918_s26, 2  ;;  %s452_s17 = scalar_lea.sflag [#allocation3], %s918_s26 }
  0x1b   : > { %617 = vmatpush3.bf16.msra.mxu0 %v690_v2  ;;  %v585_v21 = vld [vmem:[%s1006_s4] ss:$0 sm:$0xff]  ;;  %s246_s11 = scalar_lea.vmem [#allocation2], %s578_s28 }
  0x1c   : > { %s470_s12 = sshll.u32 %s246_s11, 4  ;;  %s934_s12 = int_to_ptr.vmem [resolvable:$true] %s470_s12 }
  0x1d   : > { %625 = vmatpush3.bf16.msra.mxu1 %v692_v4  ;;  %s699_s18 = scalar_lea.vmem %s934_s12, 64  ;;  %p706_p0 = scmp.lt.s32.totalorder %s934_s12, %s704_s20 }
  0x1e   : > { %626 = vmatprep.subr.bf16.mxu1 %v791_v1  ;;  %619 = vmatmul.mubr.msk.bf16.vlgmr.msra.gmra.mxu0 %vm284_vm1, %v260_v7  ;;  %p700_p11 = scmp.ne.s32.totalorder %s934_s12, %s699_s18  ;;  %p707_p1 = scmp.lt.s32.totalorder %s705_s29, %s699_s18 }
  0x20   : > { %p701_p12 = pnand %p700_p11, %p869_p5  ;;  %p708_p2 = por %p707_p1, %p706_p0 }
  0x21   : > { %627 = vmatpush3.bf16.msra.mxu1 %v693_v6 }
  0x22   : > { %628 = vmatprep.subr.bf16.mxu1 %v791_v1  ;;  %p702_p13 = pneg %p701_p12 }
  0x24   : > { %p709_p3 = pnand %p708_p2, %p702_p13 }
  0x25   : > { %629 = vmatpush3.bf16.msra.mxu1 %v694_v8 }
  0x26   : > { %630 = vmatprep.subr.bf16.mxu1 %v791_v1 }
  0x29   : > { %631 = vmatpush3.bf16.msra.mxu1 %v695_v9 }
  0x2a   : > { %632 = vmatprep.subr.bf16.mxu1 %v791_v1 }
  0x2d   : > { %633 = vmatpush3.bf16.msra.mxu1 %v696_v10 }
  0x2e   : > { %634 = vmatprep.subr.bf16.mxu1 %v791_v1 }
  0x31   : > { %635 = vmatpush3.bf16.msra.mxu1 %v697_v11 }
  0x32   : > { %636 = vmatprep.subr.bf16.mxu1 %v791_v1 }
  0x35   : > { %637 = vmatpush3.bf16.msra.mxu1 %v698_v12 }
  0xde   : > { %v322_v14 = vpop.f32.mrf.mxu0 }
  0xdf   : > { %v323_v15 = vadd.f32 %v581_v13, %v322_v14 }
  0xe0   : > { %v620_v16 = vpop.f32.mrf.mxu0 }
  0xe1   : > { %v328_v17 = vmax.f32 %v323_v15, 0.0 }
  0xe2   : > { %v325_v18 = vpop.f32.mrf.mxu0 }
  0xe3   : > { %v329_v19 = vpack.c.bf16 %v328_v17, %v328_v17 }
  0xe4   : > { %v621_v20 = vpop.f32.mrf.mxu0 }
  0xe5   : > { %639 = vmatmul.mubr.bf16.vlgmr.msra.gmra.mxu1 %v329_v19 }
 0x1a5   : > { %v435_v22 = vpop.f32.mrf.mxu1 }
 0x1a6   : > { %v436_v23 = vadd.f32 %v585_v21, %v435_v22 }
 0x1a7   : > { %v640_v24 = vpop.f32.mrf.mxu1 }
 0x1a8   : > { %v441_v25 = vpack.c.bf16 %v436_v23, %v436_v23 }
 0x1a9   : > { %v438_v26 = vpop.f32.mrf.mxu1 }
 0x1aa   : > { %447 = vrot.lane.b32.xlu0 %v441_v25, %s793_s16  ;;  %443 = vst.msk [vmem:[%s246_s11] sm:$0xf] %vm442_vm2, %v441_v25 }
 0x1ab   : > { %v641_v27 = vpop.f32.mrf.mxu1 }
 0x1ac   : > { %712 = shalt.err (!%p709_p3)
}
 0x1ad   : > { %s713_s9 = scalar_lea.hbm %s932_s15, 64  ;;  %s717_s14 = scalar_lea.hbm %s1007_s5, 128 }
 0x1ae   : > { %p714_p4 = scmp.ne.s32.totalorder %s932_s15, %s713_s9  ;;  %p718_p9 = scmp.lt.s32.totalorder %s932_s15, %s1007_s5 }
 0x1af   : > { %p719_p10 = scmp.lt.s32.totalorder %s717_s14, %s713_s9 }
 0x1b0   : > { %p715_p7 = pnand %p714_p4, %p869_p5 }
 0x1b1   : > { %p720_p11 = por %p719_p10, %p718_p9 }
 0x1b2   : > { %p716_p8 = pneg %p715_p7 }
 0x1b4   : > { %p721_p12 = pnand %p720_p11, %p716_p8 }
 0x1b6   : > { %724 = shalt.err (!%p721_p12)
}
 0x1b7   : > { %642 = dma.vmem_to_hbm [thread:$0]  (%p869_p5), %s934_s12, 64, %s932_s15, %s452_s17  }
 0x1b8   : > { %s253_s18 = scalar_lea.vmem [#allocation4], %s578_s28  ;;  %s965_s9 = scalar_lea.hbm %s1008_s6, %s597_s10 }
 0x1b9   : > { %s483_s20 = sshll.u32 %s253_s18, 4  ;;  %s457_s13 = scalar_lea.sflag [#allocation5], %s918_s26  ;;  %s484_s20 = int_to_ptr.vmem [resolvable:$true] %s483_s20 }
 0x1ba   : > { %s725_s14 = scalar_lea.vmem %s484_s20, 64  ;;  %s795_s12 = smov [#allocation4]  }
 0x1bb   : > { %p726_p13 = scmp.ne.s32.totalorder %s484_s20, %s725_s14  ;;  %s729_s15 = sshll.u32 %s795_s12, 4  ;;  %s730_s15 = int_to_ptr.vmem [resolvable:$false] %s729_s15 }
 0x1bc   : > { %s731_s28 = scalar_lea.vmem %s730_s15, 128  ;;  %p732_p2 = scmp.lt.s32.totalorder %s484_s20, %s730_s15 }
 0x1bd   : > { %p727_p0 = pnand %p726_p13, %p869_p5  ;;  %p733_p3 = scmp.lt.s32.totalorder %s731_s28, %s725_s14 }
 0x1bf   : > { %p728_p1 = pneg %p727_p0  ;;  %p734_p4 = por %p733_p3, %p732_p2 }
 0x1c1   : > { %p735_p7 = pnand %p734_p4, %p728_p1 }
 0x21c   : > { %v448_v28 = vpop.permute.xlu0 %447 }
 0x21d   : > { %450 = vst.msk [vmem:[%s253_s18] sm:$0xf] %vm442_vm2, %v448_v28 }
 0x21e   : > { %738 = shalt.err (!%p735_p7)
}
 0x21f   : > { %s739_s25 = scalar_lea.hbm %s965_s9, 64  ;;  %s743_s17 = scalar_lea.hbm %s1008_s6, 128 }
 0x220   : > { %p740_p8 = scmp.ne.s32.totalorder %s965_s9, %s739_s25  ;;  %p744_p11 = scmp.lt.s32.totalorder %s965_s9, %s1008_s6 }
 0x221   : > { %p745_p12 = scmp.lt.s32.totalorder %s743_s17, %s739_s25 }
 0x222   : > { %p741_p9 = pnand %p740_p8, %p869_p5 }
 0x223   : > { %p746_p13 = por %p745_p12, %p744_p11 }
 0x224   : > { %p742_p10 = pneg %p741_p9 }
 0x226   : > { %p747_p0 = pnand %p746_p13, %p742_p10 }
 0x228   : > { %750 = shalt.err (!%p747_p0)
}
 0x229   : > { %643 = dma.vmem_to_hbm [thread:$0]  (%p869_p5), %s484_s20, 64, %s965_s9, %s457_s13  }
 0x22a PF: > { %p653_p1 = scmp.ge.s32.totalorder %s789_s24, 2  ;;  %s495_s18 = sand.u32 1, %s777_s21  }
 0x22b   : > { %s496_s29 = scalar_lea.sflag [#allocation3], %s495_s18 }
 0x22c   : > { %p647_p2 = pnand %p653_p1, %p873_p6 }
 0x22e   : > { %p648_p3 = pneg %p647_p2 }
 0x230   : > { %768 = dma.done.wait (%p648_p3), %s496_s29, 64  }
 0x231   : > { %770 = vsyncadd (%p648_p3), %s496_s29, 4294967232  ;;  %s505_s11 = scalar_lea.sflag [#allocation5], %s495_s18 }
 0x232   : > { %772 = dma.done.wait (%p648_p3), %s505_s11, 64  }
 0x233   : > { %774 = vsyncadd (%p648_p3), %s505_s11, 4294967232  ;;  %p20_p5 = scmp.ge.s32.totalorder %s856_s27, 4   ;;  %s1011_s21 = smov %s781_s22 }
 0x234   : > { %s1012_s22 = smov %s785_s23  ;;  %s1013_s23 = smov %s867_s30 }
 0x235   : > { %s1014_s24 = smov %s856_s27  ;;  %22 = sbr.rel (!%p20_p5) target bundleno = 5 (0x5), region = 92 }
 0x23a   :  { %510 = vsyncpa [#allocation3], 1 }
 0x23b   :  { %512 = vsyncpa [#allocation3 + $0x1], 1 }
 0x23c   :  { %513 = vsyncpa [#allocation5], 1 }
 0x23d   :  { %515 = vsyncpa [#allocation5 + $0x1], 1 }

</bundles_post_ra>
